<compile_context>
chip_gen: v5e
topology: v5e:2x2
jax: 0.10.0
libtpu: 0.0.40
codegen_flags: <defaults>
</compile_context>

<pallas_src>
import functools

import jax
import jax.numpy as jnp
from jax.experimental import pallas as pl
from jax.experimental.pallas import tpu as pltpu


def _full_spec(shape):
    # whole-array block (allowed even when not (8,128)-aligned)
    return pl.BlockSpec(shape, lambda: (0,) * len(shape))


# ------------------------------------------------------------ fused kernel ---

def _fused_kernel(x_ref, a_ref, w_ref, b_ref, o_ref, s_ref,
                  *, n_mp, hidden, ng_pad, nc_pad, in_pad):
    f32 = jnp.float32
    bf16 = jnp.bfloat16
    H = hidden
    nt = ng_pad + nc_pad

    # 1) input FC for BOTH node types with one matmul against the lane-packed
    #    [w0_g | w0_c] weight block; Identity norm -> ReLU -> Dropout(eval)=id.
    t0 = jnp.dot(x_ref[...], w_ref[0:in_pad, :], preferred_element_type=f32)   # [nt,128]
    h_g = jnp.maximum(t0[0:ng_pad, 0:H] + b_ref[0:1, 0:H], 0.0)                # [ng,H] f32
    h_c = jnp.maximum(t0[ng_pad:nt, H:2 * H] + b_ref[0:1, H:2 * H], 0.0)       # [nc,H] f32

    a = a_ref[...]          # bf16 [nt, nt] block mean-adjacency (rows=dst, cols=src)
    jk = [h_g]              # jumping-knowledge features of 'glomeruli'

    # 2) message passing: 3 MXU issues per layer
    #    t_g = h_g @ [Wl_gg | Wl_gc | Wr_g_sum], t_c = h_c @ [Wl_cg | Wl_cc | Wr_c_sum]
    #    nbr = A_full @ [t_g ; t_c]  (fused dst-glom / dst-cell neighbor matmul)
    for l in range(n_mp):
        rg = in_pad + l * 2 * H
        rc = rg + H
        t_g = jnp.dot(h_g.astype(bf16), w_ref[rg:rg + H, :],
                      preferred_element_type=f32)                              # [ng,128]
        t_c = jnp.dot(h_c.astype(bf16), w_ref[rc:rc + H, :],
                      preferred_element_type=f32)                              # [nc,128]
        # sublane-aligned (16-row) stores into the bf16 scratch -> copy-free stacking
        s_ref[0:ng_pad, :] = t_g.astype(bf16)
        s_ref[ng_pad:nt, :] = t_c.astype(bf16)
        nbr = jnp.dot(a, s_ref[...], preferred_element_type=f32)               # [nt,128]

        bl = b_ref[1 + l:2 + l, :]                                             # [1,128] f32
        new_g = nbr[0:ng_pad, 0:H] + t_g[:, 2 * H:3 * H] + bl[:, 0:H]
        new_c = nbr[ng_pad:nt, H:2 * H] + t_c[:, 2 * H:3 * H] + bl[:, H:2 * H]
        h_g = jnp.maximum(new_g, 0.0)
        h_c = jnp.maximum(new_c, 0.0)
        jk.append(h_g)

    # 3) JK concat + readout Linear + softmax(dim=1).
    #    concat(jk,axis=1) @ W_out == sum_i jk[i] @ W_out[i*H:(i+1)*H]  (no lane concat).
    r0 = in_pad + n_mp * 2 * H
    logits = b_ref[1 + n_mp:2 + n_mp, :]        # [1,128] f32; padded classes hold -1e30
    for i in range(n_mp + 1):
        logits = logits + jnp.dot(jk[i].astype(bf16),
                                  w_ref[r0 + i * H:r0 + (i + 1) * H, :],
                                  preferred_element_type=f32)
    m = jnp.max(logits, axis=1, keepdims=True)
    e = jnp.exp(logits - m)
    denom = jnp.sum(e, axis=1, keepdims=True)
    # approx reciprocal (EUP): rows sum to 1 within ~1e-3
    o_ref[...] = (e * pl.reciprocal(denom, approx=True)).astype(o_ref.dtype)


def build_fused_forward(n_mp, hidden, ng_pad, nc_pad, in_pad, out_pad):
    n_tot = ng_pad + nc_pad
    kernel = functools.partial(_fused_kernel, n_mp=n_mp, hidden=hidden,
                               ng_pad=ng_pad, nc_pad=nc_pad, in_pad=in_pad)

    @jax.jit
    def fwd(x_all, a_full, w_slab, b_slab):
        return pl.pallas_call(
            kernel,
            out_shape=jax.ShapeDtypeStruct((ng_pad, out_pad), jnp.float32),
            in_specs=[_full_spec(x_all.shape), _full_spec(a_full.shape),
                      _full_spec(w_slab.shape), _full_spec(b_slab.shape)],
            out_specs=_full_spec((ng_pad, out_pad)),
            scratch_shapes=[pltpu.VMEM((n_tot, 128), jnp.bfloat16)],
        )(x_all, a_full, w_slab, b_slab)

    return fwd


# ----------------------------------------------------------------- glue -----
# (pure-JAX, run ONCE per graph / parameter set, outside the jitted forward)

def mean_adjacency(edge_index, n_src, n_dst, n_src_pad, n_dst_pad):
    """Row-normalized dense adjacency so A @ x_src = mean over in-edges, zero-padded."""
    src, dst = edge_index[0], edge_index[1]
    a = jnp.zeros((n_dst, n_src), jnp.float32).at[dst, src].add(1.0)
    deg = jnp.sum(a, axis=1, keepdims=True)
    a = a / jnp.maximum(deg, 1.0)
    return jnp.pad(a, ((0, n_dst_pad - n_dst), (0, n_src_pad - n_src)))


# ----------------------------------------------------------------- main -----

if __name__ == "__main__":
    HIDDEN = 32
    IN_DIM = 8
    IN_PAD = 16            # K of the input FC padded to a bf16 sublane tile
    OUT_DIM = 3
    OUT_PAD = 128          # lane-dense readout / output (extra classes masked via -1e30)
    N_MP = 2
    N_EDGES = 40

    num_nodes = {"glomeruli": 12, "cellA": 20}
    NG, NC = num_nodes["glomeruli"], num_nodes["cellA"]
    NG_PAD, NC_PAD = 16, 32        # multiples of 16 (bf16 sublane tile)
    N_TOT = NG_PAD + NC_PAD        # 48

    node_types = ["glomeruli", "cellA"]
    edge_types = [
        ("glomeruli", "to", "glomeruli"),
        ("cellA", "to", "glomeruli"),
        ("glomeruli", "to", "cellA"),
        ("cellA", "to", "cellA"),
    ]

    key = jax.random.PRNGKey(0)
    keys = iter(jax.random.split(key, 64))

    x_dict = {
        nt: jax.random.normal(next(keys), (num_nodes[nt], IN_DIM), jnp.float32)
        for nt in node_types
    }

    def random_edge_index(k, n_src, n_dst, n_edges):
        k1, k2 = jax.random.split(k)
        src = jax.random.randint(k1, (n_edges,), 0, n_src)
        dst = jax.random.randint(k2, (n_edges,), 0, n_dst)
        return jnp.stack([src, dst], axis=0)

    edge_index_dict = {
        et: random_edge_index(next(keys), num_nodes[et[0]], num_nodes[et[2]], N_EDGES)
        for et in edge_types
    }

    def lin_params(din, dout):
        return {
            "w": 0.1 * jax.random.normal(next(keys), (din, dout), jnp.float32),
            "b": 0.1 * jax.random.normal(next(keys), (1, dout), jnp.float32),
        }

    def sage_params(h):
        return {
            "wl": 0.1 * jax.random.normal(next(keys), (h, h), jnp.float32),
            "bl": 0.1 * jax.random.normal(next(keys), (1, h), jnp.float32),
            "wr": 0.1 * jax.random.normal(next(keys), (h, h), jnp.float32),
        }

    params = {
        "fc0": {nt: lin_params(IN_DIM, HIDDEN) for nt in node_types},
        "mp": [{et: sage_params(HIDDEN) for et in edge_types} for _ in range(N_MP)],
        "out": lin_params((N_MP + 1) * HIDDEN, OUT_DIM),
    }

    # -------- one-time packing into 4 lane-dense slabs (hoisted out of jit) --------
    pads = {"glomeruli": NG_PAD, "cellA": NC_PAD}
    offs = {"glomeruli": 0, "cellA": NG_PAD}

    # (a) block adjacency A_full [N_TOT, N_TOT]  (rows = dst nodes, cols = src nodes)
    a_full = jnp.zeros((N_TOT, N_TOT), jnp.float32)
    for (s, _, d) in edge_types:
        blk = mean_adjacency(edge_index_dict[(s, "to", d)], num_nodes[s], num_nodes[d],
                             pads[s], pads[d])                       # [pads[d], pads[s]]
        a_full = a_full.at[offs[d]:offs[d] + pads[d],
                           offs[s]:offs[s] + pads[s]].set(blk)
    a_full = a_full.astype(jnp.bfloat16)

    # (b) node-feature slab [N_TOT, IN_PAD]
    x_all = jnp.zeros((N_TOT, IN_PAD), jnp.float32)
    x_all = x_all.at[0:NG, 0:IN_DIM].set(x_dict["glomeruli"])
    x_all = x_all.at[NG_PAD:NG_PAD + NC, 0:IN_DIM].set(x_dict["cellA"])
    x_all = x_all.astype(jnp.bfloat16)

    # (c) weight slab [240, 128] bf16, all row offsets multiples of 16
    W_ROWS = IN_PAD + N_MP * 2 * HIDDEN + (N_MP + 1) * HIDDEN
    w_slab = jnp.zeros((W_ROWS, 128), jnp.float32)
    w_slab = w_slab.at[0:IN_DIM, 0:HIDDEN].set(params["fc0"]["glomeruli"]["w"])
    w_slab = w_slab.at[0:IN_DIM, HIDDEN:2 * HIDDEN].set(params["fc0"]["cellA"]["w"])
    for l in range(N_MP):
        p = params["mp"][l]
        rg = IN_PAD + l * 2 * HIDDEN
        rc = rg + HIDDEN
        wr_g = (p[("glomeruli", "to", "glomeruli")]["wr"]
                + p[("cellA", "to", "glomeruli")]["wr"])
        wr_c = (p[("glomeruli", "to", "cellA")]["wr"]
                + p[("cellA", "to", "cellA")]["wr"])
        w_slab = w_slab.at[rg:rg + HIDDEN, 0:HIDDEN].set(
            p[("glomeruli", "to", "glomeruli")]["wl"])
        w_slab = w_slab.at[rg:rg + HIDDEN, HIDDEN:2 * HIDDEN].set(
            p[("glomeruli", "to", "cellA")]["wl"])
        w_slab = w_slab.at[rg:rg + HIDDEN, 2 * HIDDEN:3 * HIDDEN].set(wr_g)
        w_slab = w_slab.at[rc:rc + HIDDEN, 0:HIDDEN].set(
            p[("cellA", "to", "glomeruli")]["wl"])
        w_slab = w_slab.at[rc:rc + HIDDEN, HIDDEN:2 * HIDDEN].set(
            p[("cellA", "to", "cellA")]["wl"])
        w_slab = w_slab.at[rc:rc + HIDDEN, 2 * HIDDEN:3 * HIDDEN].set(wr_c)
    r0 = IN_PAD + N_MP * 2 * HIDDEN
    w_slab = w_slab.at[r0:r0 + (N_MP + 1) * HIDDEN, 0:OUT_DIM].set(params["out"]["w"])
    w_slab = w_slab.astype(jnp.bfloat16)

    # (d) bias slab [8, 128] f32 (biases / softmax mask stay full precision)
    b_slab = jnp.zeros((8, 128), jnp.float32)
    b_slab = b_slab.at[0, 0:HIDDEN].set(params["fc0"]["glomeruli"]["b"][0])
    b_slab = b_slab.at[0, HIDDEN:2 * HIDDEN].set(params["fc0"]["cellA"]["b"][0])
    for l in range(N_MP):
        p = params["mp"][l]
        bl_g = (p[("glomeruli", "to", "glomeruli")]["bl"]
                + p[("cellA", "to", "glomeruli")]["bl"])
        bl_c = (p[("glomeruli", "to", "cellA")]["bl"]
                + p[("cellA", "to", "cellA")]["bl"])
        b_slab = b_slab.at[1 + l, 0:HIDDEN].set(bl_g[0])
        b_slab = b_slab.at[1 + l, HIDDEN:2 * HIDDEN].set(bl_c[0])
    b_slab = b_slab.at[1 + N_MP, :].set(-1e30)                 # mask padded classes
    b_slab = b_slab.at[1 + N_MP, 0:OUT_DIM].set(params["out"]["b"][0])

    # ------------------------------- run ----------------------------------
    fwd = build_fused_forward(N_MP, HIDDEN, NG_PAD, NC_PAD, IN_PAD, OUT_PAD)
    out_padded = fwd(x_all, a_full, w_slab, b_slab)
    out = out_padded[:NG, :OUT_DIM]
    jax.block_until_ready(out)

    assert out.shape == (NG, OUT_DIM)
    assert bool(jnp.isfinite(out).all())
    assert bool(jnp.allclose(jnp.sum(out, axis=1), 1.0, atol=1e-2))
    print("KERNEL_OK")
</pallas_src>

<mosaic_0001>
module attributes {stable_mosaic.version = 11 : i64} {
  func.func @_fused_kernel(%arg0: memref<48x16xbf16, #tpu.memory_space<vmem>>, %arg1: memref<48x48xbf16, #tpu.memory_space<vmem>>, %arg2: memref<240x128xbf16, #tpu.memory_space<vmem>>, %arg3: memref<8x128xf32, #tpu.memory_space<vmem>>, %arg4: memref<16x128xf32, #tpu.memory_space<vmem>>, %arg5: memref<48x128xbf16, #tpu.memory_space<vmem>>) attributes {dimension_semantics = [], scalar_prefetch = 0 : i64, scratch_operands = 1 : i64, tpu.core_type = #tpu.core_type<tc>} {
    %c0 = arith.constant 0 : index
    %c0_0 = arith.constant 0 : index
    %0 = vector.load %arg0[%c0, %c0_0] : memref<48x16xbf16, #tpu.memory_space<vmem>>, vector<48x16xbf16>
    %c0_1 = arith.constant 0 : index
    %c0_2 = arith.constant 0 : index
    %1 = vector.load %arg2[%c0_1, %c0_2] : memref<240x128xbf16, #tpu.memory_space<vmem>>, vector<16x128xbf16>
    %cst = arith.constant dense<0.000000e+00> : vector<48x128xf32>
    %2 = tpu.matmul %0, %1, %cst {dimension_numbers = #tpu.dot_dimension_numbers<[1], [0], [0], [1], [0, 0, 1, 1], [], []>} : vector<48x16xbf16>, vector<16x128xbf16>, vector<48x128xf32> -> vector<48x128xf32>
    %3 = vector.extract_strided_slice %2 {offsets = [0, 0], sizes = [16, 32], strides = [1, 1]} : vector<48x128xf32> to vector<16x32xf32>
    %c0_3 = arith.constant 0 : index
    %c0_4 = arith.constant 0 : index
    %4 = vector.load %arg3[%c0_3, %c0_4] : memref<8x128xf32, #tpu.memory_space<vmem>>, vector<1x32xf32>
    %5 = vector.broadcast %4 : vector<1x32xf32> to vector<16x32xf32>
    %6 = arith.addf %3, %5 : vector<16x32xf32>
    %cst_5 = arith.constant 0.000000e+00 : f32
    %7 = vector.broadcast %cst_5 : f32 to vector<16x32xf32>
    %8 = arith.maximumf %6, %7 : vector<16x32xf32>
    %9 = vector.extract_strided_slice %2 {offsets = [16, 32], sizes = [32, 32], strides = [1, 1]} : vector<48x128xf32> to vector<32x32xf32>
    %c0_6 = arith.constant 0 : index
    %c32 = arith.constant 32 : index
    %10 = vector.load %arg3[%c0_6, %c32] : memref<8x128xf32, #tpu.memory_space<vmem>>, vector<1x32xf32>
    %11 = vector.broadcast %10 : vector<1x32xf32> to vector<32x32xf32>
    %12 = arith.addf %9, %11 : vector<32x32xf32>
    %cst_7 = arith.constant 0.000000e+00 : f32
    %13 = vector.broadcast %cst_7 : f32 to vector<32x32xf32>
    %14 = arith.maximumf %12, %13 : vector<32x32xf32>
    %c0_8 = arith.constant 0 : index
    %c0_9 = arith.constant 0 : index
    %15 = vector.load %arg1[%c0_8, %c0_9] : memref<48x48xbf16, #tpu.memory_space<vmem>>, vector<48x48xbf16>
    %16 = arith.truncf %8 : vector<16x32xf32> to vector<16x32xbf16>
    %c16 = arith.constant 16 : index
    %c0_10 = arith.constant 0 : index
    %17 = vector.load %arg2[%c16, %c0_10] : memref<240x128xbf16, #tpu.memory_space<vmem>>, vector<32x128xbf16>
    %cst_11 = arith.constant dense<0.000000e+00> : vector<16x128xf32>
    %18 = tpu.matmul %16, %17, %cst_11 {dimension_numbers = #tpu.dot_dimension_numbers<[1], [0], [0], [1], [0, 0, 1, 1], [], []>} : vector<16x32xbf16>, vector<32x128xbf16>, vector<16x128xf32> -> vector<16x128xf32>
    %19 = arith.truncf %14 : vector<32x32xf32> to vector<32x32xbf16>
    %c48 = arith.constant 48 : index
    %c0_12 = arith.constant 0 : index
    %20 = vector.load %arg2[%c48, %c0_12] : memref<240x128xbf16, #tpu.memory_space<vmem>>, vector<32x128xbf16>
    %cst_13 = arith.constant dense<0.000000e+00> : vector<32x128xf32>
    %21 = tpu.matmul %19, %20, %cst_13 {dimension_numbers = #tpu.dot_dimension_numbers<[1], [0], [0], [1], [0, 0, 1, 1], [], []>} : vector<32x32xbf16>, vector<32x128xbf16>, vector<32x128xf32> -> vector<32x128xf32>
    %22 = arith.truncf %18 : vector<16x128xf32> to vector<16x128xbf16>
    %c0_14 = arith.constant 0 : index
    %c0_15 = arith.constant 0 : index
    %23 = vector.load %arg5[%c0_14, %c0_15] : memref<48x128xbf16, #tpu.memory_space<vmem>>, vector<16x128xbf16>
    tpu.vector_store %arg5[%c0_14, %c0_15], %22 {strides = array<i32>} : memref<48x128xbf16, #tpu.memory_space<vmem>>, vector<16x128xbf16>,
    %24 = arith.truncf %21 : vector<32x128xf32> to vector<32x128xbf16>
    %c16_16 = arith.constant 16 : index
    %c0_17 = arith.constant 0 : index
    %25 = vector.load %arg5[%c16_16, %c0_17] : memref<48x128xbf16, #tpu.memory_space<vmem>>, vector<32x128xbf16>
    tpu.vector_store %arg5[%c16_16, %c0_17], %24 {strides = array<i32>} : memref<48x128xbf16, #tpu.memory_space<vmem>>, vector<32x128xbf16>,
    %c0_18 = arith.constant 0 : index
    %c0_19 = arith.constant 0 : index
    %26 = vector.load %arg5[%c0_18, %c0_19] : memref<48x128xbf16, #tpu.memory_space<vmem>>, vector<48x128xbf16>
    %cst_20 = arith.constant dense<0.000000e+00> : vector<48x128xf32>
    %27 = tpu.matmul %15, %26, %cst_20 {dimension_numbers = #tpu.dot_dimension_numbers<[1], [0], [0], [1], [0, 0, 1, 1], [], []>} : vector<48x48xbf16>, vector<48x128xbf16>, vector<48x128xf32> -> vector<48x128xf32>
    %c1 = arith.constant 1 : index
    %c0_21 = arith.constant 0 : index
    %28 = vector.load %arg3[%c1, %c0_21] : memref<8x128xf32, #tpu.memory_space<vmem>>, vector<1x128xf32>
    %29 = vector.extract_strided_slice %27 {offsets = [0, 0], sizes = [16, 32], strides = [1, 1]} : vector<48x128xf32> to vector<16x32xf32>
    %30 = vector.extract_strided_slice %18 {offsets = [0, 64], sizes = [16, 32], strides = [1, 1]} : vector<16x128xf32> to vector<16x32xf32>
    %31 = arith.addf %29, %30 : vector<16x32xf32>
    %32 = vector.extract_strided_slice %28 {offsets = [0, 0], sizes = [1, 32], strides = [1, 1]} : vector<1x128xf32> to vector<1x32xf32>
    %33 = vector.broadcast %32 : vector<1x32xf32> to vector<16x32xf32>
    %34 = arith.addf %31, %33 : vector<16x32xf32>
    %35 = vector.extract_strided_slice %27 {offsets = [16, 32], sizes = [32, 32], strides = [1, 1]} : vector<48x128xf32> to vector<32x32xf32>
    %36 = vector.extract_strided_slice %21 {offsets = [0, 64], sizes = [32, 32], strides = [1, 1]} : vector<32x128xf32> to vector<32x32xf32>
    %37 = arith.addf %35, %36 : vector<32x32xf32>
    %38 = vector.extract_strided_slice %28 {offsets = [0, 32], sizes = [1, 32], strides = [1, 1]} : vector<1x128xf32> to vector<1x32xf32>
    %39 = vector.broadcast %38 : vector<1x32xf32> to vector<32x32xf32>
    %40 = arith.addf %37, %39 : vector<32x32xf32>
    %cst_22 = arith.constant 0.000000e+00 : f32
    %41 = vector.broadcast %cst_22 : f32 to vector<16x32xf32>
    %42 = arith.maximumf %34, %41 : vector<16x32xf32>
    %cst_23 = arith.constant 0.000000e+00 : f32
    %43 = vector.broadcast %cst_23 : f32 to vector<32x32xf32>
    %44 = arith.maximumf %40, %43 : vector<32x32xf32>
    %45 = arith.truncf %42 : vector<16x32xf32> to vector<16x32xbf16>
    %c80 = arith.constant 80 : index
    %c0_24 = arith.constant 0 : index
    %46 = vector.load %arg2[%c80, %c0_24] : memref<240x128xbf16, #tpu.memory_space<vmem>>, vector<32x128xbf16>
    %cst_25 = arith.constant dense<0.000000e+00> : vector<16x128xf32>
    %47 = tpu.matmul %45, %46, %cst_25 {dimension_numbers = #tpu.dot_dimension_numbers<[1], [0], [0], [1], [0, 0, 1, 1], [], []>} : vector<16x32xbf16>, vector<32x128xbf16>, vector<16x128xf32> -> vector<16x128xf32>
    %48 = arith.truncf %44 : vector<32x32xf32> to vector<32x32xbf16>
    %c112 = arith.constant 112 : index
    %c0_26 = arith.constant 0 : index
    %49 = vector.load %arg2[%c112, %c0_26] : memref<240x128xbf16, #tpu.memory_space<vmem>>, vector<32x128xbf16>
    %cst_27 = arith.constant dense<0.000000e+00> : vector<32x128xf32>
    %50 = tpu.matmul %48, %49, %cst_27 {dimension_numbers = #tpu.dot_dimension_numbers<[1], [0], [0], [1], [0, 0, 1, 1], [], []>} : vector<32x32xbf16>, vector<32x128xbf16>, vector<32x128xf32> -> vector<32x128xf32>
    %51 = arith.truncf %47 : vector<16x128xf32> to vector<16x128xbf16>
    %c0_28 = arith.constant 0 : index
    %c0_29 = arith.constant 0 : index
    %52 = vector.load %arg5[%c0_28, %c0_29] : memref<48x128xbf16, #tpu.memory_space<vmem>>, vector<16x128xbf16>
    tpu.vector_store %arg5[%c0_28, %c0_29], %51 {strides = array<i32>} : memref<48x128xbf16, #tpu.memory_space<vmem>>, vector<16x128xbf16>,
    %53 = arith.truncf %50 : vector<32x128xf32> to vector<32x128xbf16>
    %c16_30 = arith.constant 16 : index
    %c0_31 = arith.constant 0 : index
    %54 = vector.load %arg5[%c16_30, %c0_31] : memref<48x128xbf16, #tpu.memory_space<vmem>>, vector<32x128xbf16>
    tpu.vector_store %arg5[%c16_30, %c0_31], %53 {strides = array<i32>} : memref<48x128xbf16, #tpu.memory_space<vmem>>, vector<32x128xbf16>,
    %c0_32 = arith.constant 0 : index
    %c0_33 = arith.constant 0 : index
    %55 = vector.load %arg5[%c0_32, %c0_33] : memref<48x128xbf16, #tpu.memory_space<vmem>>, vector<48x128xbf16>
    %cst_34 = arith.constant dense<0.000000e+00> : vector<48x128xf32>
    %56 = tpu.matmul %15, %55, %cst_34 {dimension_numbers = #tpu.dot_dimension_numbers<[1], [0], [0], [1], [0, 0, 1, 1], [], []>} : vector<48x48xbf16>, vector<48x128xbf16>, vector<48x128xf32> -> vector<48x128xf32>
    %c2 = arith.constant 2 : index
    %c0_35 = arith.constant 0 : index
    %57 = vector.load %arg3[%c2, %c0_35] : memref<8x128xf32, #tpu.memory_space<vmem>>, vector<1x128xf32>
    %58 = vector.extract_strided_slice %56 {offsets = [0, 0], sizes = [16, 32], strides = [1, 1]} : vector<48x128xf32> to vector<16x32xf32>
    %59 = vector.extract_strided_slice %47 {offsets = [0, 64], sizes = [16, 32], strides = [1, 1]} : vector<16x128xf32> to vector<16x32xf32>
    %60 = arith.addf %58, %59 : vector<16x32xf32>
    %61 = vector.extract_strided_slice %57 {offsets = [0, 0], sizes = [1, 32], strides = [1, 1]} : vector<1x128xf32> to vector<1x32xf32>
    %62 = vector.broadcast %61 : vector<1x32xf32> to vector<16x32xf32>
    %63 = arith.addf %60, %62 : vector<16x32xf32>
    %cst_36 = arith.constant 0.000000e+00 : f32
    %64 = vector.broadcast %cst_36 : f32 to vector<16x32xf32>
    %65 = arith.maximumf %63, %64 : vector<16x32xf32>
    %c3 = arith.constant 3 : index
    %c0_37 = arith.constant 0 : index
    %66 = vector.load %arg3[%c3, %c0_37] : memref<8x128xf32, #tpu.memory_space<vmem>>, vector<1x128xf32>
    %67 = arith.truncf %8 : vector<16x32xf32> to vector<16x32xbf16>
    %c144 = arith.constant 144 : index
    %c0_38 = arith.constant 0 : index
    %68 = vector.load %arg2[%c144, %c0_38] : memref<240x128xbf16, #tpu.memory_space<vmem>>, vector<32x128xbf16>
    %cst_39 = arith.constant dense<0.000000e+00> : vector<16x128xf32>
    %69 = tpu.matmul %67, %68, %cst_39 {dimension_numbers = #tpu.dot_dimension_numbers<[1], [0], [0], [1], [0, 0, 1, 1], [], []>} : vector<16x32xbf16>, vector<32x128xbf16>, vector<16x128xf32> -> vector<16x128xf32>
    %70 = vector.broadcast %66 : vector<1x128xf32> to vector<16x128xf32>
    %71 = arith.addf %70, %69 : vector<16x128xf32>
    %72 = arith.truncf %42 : vector<16x32xf32> to vector<16x32xbf16>
    %c176 = arith.constant 176 : index
    %c0_40 = arith.constant 0 : index
    %73 = vector.load %arg2[%c176, %c0_40] : memref<240x128xbf16, #tpu.memory_space<vmem>>, vector<32x128xbf16>
    %cst_41 = arith.constant dense<0.000000e+00> : vector<16x128xf32>
    %74 = tpu.matmul %72, %73, %cst_41 {dimension_numbers = #tpu.dot_dimension_numbers<[1], [0], [0], [1], [0, 0, 1, 1], [], []>} : vector<16x32xbf16>, vector<32x128xbf16>, vector<16x128xf32> -> vector<16x128xf32>
    %75 = arith.addf %71, %74 : vector<16x128xf32>
    %76 = arith.truncf %65 : vector<16x32xf32> to vector<16x32xbf16>
    %c208 = arith.constant 208 : index
    %c0_42 = arith.constant 0 : index
    %77 = vector.load %arg2[%c208, %c0_42] : memref<240x128xbf16, #tpu.memory_space<vmem>>, vector<32x128xbf16>
    %cst_43 = arith.constant dense<0.000000e+00> : vector<16x128xf32>
    %78 = tpu.matmul %76, %77, %cst_43 {dimension_numbers = #tpu.dot_dimension_numbers<[1], [0], [0], [1], [0, 0, 1, 1], [], []>} : vector<16x32xbf16>, vector<32x128xbf16>, vector<16x128xf32> -> vector<16x128xf32>
    %79 = arith.addf %75, %78 : vector<16x128xf32>
    %cst_44 = arith.constant dense<0xFF800000> : vector<16xf32>
    %80 = vector.multi_reduction <maximumf>, %79, %cst_44 [1] : vector<16x128xf32> to vector<16xf32>
    %81 = vector.shape_cast %80 : vector<16xf32> to vector<16x1xf32>
    %82 = vector.broadcast %81 : vector<16x1xf32> to vector<16x128xf32>
    %83 = arith.subf %79, %82 : vector<16x128xf32>
    %84 = math.exp %83 : vector<16x128xf32>
    %cst_45 = arith.constant dense<0.000000e+00> : vector<16xf32>
    %85 = vector.multi_reduction <add>, %84, %cst_45 [1] : vector<16x128xf32> to vector<16xf32>
    %86 = vector.shape_cast %85 : vector<16xf32> to vector<16x1xf32>
    %87 = tpu.reciprocal %86 {approx = true} : vector<16x1xf32> -> vector<16x1xf32>
    %88 = vector.broadcast %87 : vector<16x1xf32> to vector<16x128xf32>
    %89 = arith.mulf %84, %88 : vector<16x128xf32>
    %c0_46 = arith.constant 0 : index
    %c0_47 = arith.constant 0 : index
    %90 = vector.load %arg4[%c0_46, %c0_47] : memref<16x128xf32, #tpu.memory_space<vmem>>, vector<16x128xf32>
    tpu.vector_store %arg4[%c0_46, %c0_47], %89 {strides = array<i32>} : memref<16x128xf32, #tpu.memory_space<vmem>>, vector<16x128xf32>,
    return
  }
}

</mosaic_0001>

<bundles_post_ra>
// kernel: fwd.1
= control target key start
LH: loop header
LB: loop body
LE: loop exit
PB: predicated region body
PF: predicated region fallthrough
CT: control target
= control target key end

     0   :  { %9 = vsyncpa [#allocation4], 0  ;;  %s994_s0 = inlined_call_operand.vmem [shape: bf16[48,16], index: 0, kind: input, shape index: {}]   ;;  %s995_s1 = inlined_call_operand.vmem [shape: bf16[48,48], index: 1, kind: input, shape index: {}]   ;;  %s996_s2 = inlined_call_operand.hbm [shape: bf16[240,128], index: 2, kind: input, shape index: {}]   ;;  %s997_s3 = inlined_call_operand.vmem [shape: f32[8,128], index: 3, kind: input, shape index: {}]   ;;  %s998_s4 = inlined_call_operand.hbm [shape: f32[16,128], index: 4, kind: output, shape index: {}]  }
   0x1   :  { %10 = vsyncpa [#allocation5], 0  ;;  %s19_s17 = sshll.u32 %s996_s2, 4  ;;  %s885_s18 = smov [#allocation3]   ;;  %s20_s17 = int_to_ptr.hbm [resolvable:$true] %s19_s17 }
   0x2   :  { %s21_s19 = sshll.u32 %s885_s18, 4  ;;  %s886_s20 = smov 64   ;;  %s22_s19 = int_to_ptr.vmem [resolvable:$true] %s21_s19 }
   0x3   :  { %s887_s21 = smov 4  }
   0x4   :  { %27 = dma.hbm_to_vmem [thread:$0]  %s20_s17, 1920, %s22_s19, [#allocation4], %s886_s20, %s886_s20, %s887_s21  }
   0x5   :  { %881 = dma.done.wait [#allocation4], 1920  }
   0x6   :  { %882 = vsyncadd [#allocation4], 4294965376  ;;  %v756_v0 = vld [vmem:[#allocation3] sm:$0xff]  ;;  %v753_v1 = vld [vmem:[%s994_s0] sm:$0xff]  ;;  %vm64_vm0 = vcmask 130048   ;;  %vm135_vm1 = vcmask 261120  }
   0x7   :  { %81 = vmatpush.bf16.msra.mxu0 %v756_v0  ;;  %v754_v2 = vld [vmem:[%s994_s0 + $0x8] sm:$0xff]  ;;  %v755_v3 = vld [vmem:[%s994_s0 + $0x10] sm:$0xff]  ;;  %v760_v6 = vld [vmem:[#allocation3 + $0x8] sm:$0xff]  ;;  %s888_s0 = smov 96   ;;  %vm253_vm2 = vcmask 392192   ;;  %s614_s17 = sshll.u32 %s998_s4, 4  ;;  %s615_s17 = int_to_ptr.hbm [resolvable:$true] %s614_s17 }
   0x8   :  { %v761_v4 = vld [vmem:[#allocation3 + $0x10] sm:$0xff]  ;;  %v774_v7 = vld [vmem:[#allocation3 + $0x48] sm:$0xff]  ;;  %v763_v16 = vld [vmem:[#allocation3 + $0x20] sm:$0xff]  ;;  %s890_s18 = smov 128   ;;  %s891_s19 = smov 8  }
   0x9   :  { %v775_v5 = vld [vmem:[#allocation3 + $0x50] sm:$0xff]  ;;  %145 = vmatpush.bf16.msra.mxu1 %v761_v4  ;;  %v821_v9 = vld [vmem:[%s997_s3] ss:$0 sm:$0xff]  ;;  %189 = vmatpush.bf16.msra.mxu2 %v763_v16  ;;  %v762_v31 = vld [vmem:[#allocation3 + $0x18] sm:$0xff] }
   0xa   :  { %643 = vmatmul.msk.bf16.vlgmr.msra.gmra.mxu0 %vm64_vm0, %v753_v1  ;;  %v949_v46 = vld [vmem:[%s995_s1] sm:$0xff]  ;;  %v956_v47 = vld [vmem:[%s995_s1 + $0x8] sm:$0xff]  ;;  %v963_v48 = vld [vmem:[%s995_s1 + $0x10] sm:$0xff] }
   0xb   :  { %509 = vmatpush.bf16.msrb.mxu0 %v775_v5  ;;  %v768_v49 = vld [vmem:[#allocation3 + $0x30] sm:$0xff]  ;;  %v777_v50 = vld [vmem:[#allocation3 + $0x60] sm:$0xff]  ;;  %v767_v51 = vld [vmem:[#allocation3 + $0x28] sm:$0xff] }
   0xc   :  { %v776_v52 = vld [vmem:[#allocation3 + $0x58] sm:$0xff]  ;;  %v823_v58 = vld [vmem:[%s997_s3 + $0x1] ss:$0 sm:$0xff]  ;;  %v770_v4 = vld [vmem:[#allocation3 + $0x40] sm:$0xff] }
   0xd   :  { %146 = vmatpush.bf16.msra.mxu1 %v760_v6  ;;  %190 = vmatpush.bf16.msra.mxu2 %v762_v31  ;;  %v769_v5 = vld [vmem:[#allocation3 + $0x38] sm:$0xff] }
   0xf   :  { %510 = vmatpush.bf16.msrb.mxu0 %v774_v7 }
  0x11   :  { %357 = vmatpush.bf16.msrb.mxu1 %v768_v49 }
  0x15   :  { %358 = vmatpush.bf16.msrb.mxu1 %v767_v51 }
  0x1a   :  { %644 = vmatmul.msk.bf16.gmra.mxu0 %vm64_vm0, %v754_v2 }
  0x2a   :  { %645 = vmatmul.msk.bf16.gmra.mxu0 %vm64_vm0, %v755_v3 }
  0x87   :  { %v83_v8 = vpop.f32.mrf.mxu0 }
  0x88   :  { %v100_v10 = vadd.f32 %v821_v9, %v83_v8 }
  0x8a   :  { %v102_v13 = vmax.f32 %v100_v10, 0.0 }
  0x8f   :  { %v85_v11 = vpop.f32.mrf.mxu0 }
  0x90   :  { %v101_v12 = vadd.f32 %v821_v9, %v85_v11 }
  0x92   :  { %v103_v14 = vmax.f32 %v101_v12, 0.0 }
  0x94   :  { %v118_v15 = vpack.c.bf16 %v103_v14, %v102_v13 }
  0x96   :  { %654 = vmatmul.msk.bf16.vlgmr.msra.gmra.mxu1 %vm135_vm1, %v118_v15  ;;  %734 = vmatmul.msk.bf16.vlgmr.msrb.gmra.mxu0 %vm135_vm1, %v118_v15 }
  0x97   :  { %v88_v17 = vpop.f32.mrf.mxu0  ;;  %401 = vmatpush.bf16.msra.mxu1 %v770_v4 }
  0x98   :  { %v104_v18 = vadd.f32 %v821_v9, %v88_v17 }
  0x9a   :  { %v108_v21 = vmax.f32 %v104_v18, 0.0 }
  0x9b   :  { %402 = vmatpush.bf16.msra.mxu1 %v769_v5 }
  0x9f   :  { %v90_v19 = vpop.f32.mrf.mxu0 }
  0xa0   :  { %v105_v20 = vadd.f32 %v821_v9, %v90_v19 }
  0xa2   :  { %v109_v22 = vmax.f32 %v105_v20, 0.0 }
  0xa4   :  { %v153_v23 = vpack.c.bf16 %v109_v22, %v108_v21 }
  0xa6   :  { %161 = vrot.lane.b32.xlu0 %v153_v23, %s888_s0 }
  0xa7   :  { %v93_v24 = vpop.f32.mrf.mxu0 }
  0xa8   :  { %v106_v25 = vadd.f32 %v821_v9, %v93_v24 }
  0xaa   :  { %v110_v28 = vmax.f32 %v106_v25, 0.0 }
  0xaf   :  { %v95_v26 = vpop.f32.mrf.mxu0 }
  0xb0   :  { %v107_v27 = vadd.f32 %v821_v9, %v95_v26 }
  0xb2   :  { %v111_v29 = vmax.f32 %v107_v27, 0.0 }
  0xb4   :  { %v154_v30 = vpack.c.bf16 %v111_v29, %v110_v28 }
  0xb6   :  { %163 = vrot.lane.b32.xlu0 %v154_v30, %s888_s0 }
 0x113   :  { %v148_v32 = vpop.f32.mrf.mxu1 }
 0x114   :  { %290 = vrot.lane.b32.xlu0 %v148_v32, %s886_s20 }
 0x118   :  { %v162_v33 = vpop.permute.xlu0 %161 }
 0x119   :  { %663 = vmatmul.msk.bf16.vlgmr.msra.gmra.mxu2 %vm135_vm1, %v162_v33 }
 0x11b   :  { %v150_v34 = vpop.f32.mrf.mxu1 }
 0x11c   :  { %v783_v35 = vpack.c.bf16 %v150_v34, %v148_v32 }
 0x11e   :  { %784 = vst [vmem:[#allocation2 + $0x10] sm:$0xff] %v783_v35  }
 0x125   :  { %v764_v45 = vld [vmem:[#allocation2 + $0x10] sm:$0xff] }
 0x128   :  { %v164_v36 = vpop.permute.xlu0 %163 }
 0x129   :  { %664 = vmatmul.msk.bf16.gmra.mxu2 %vm135_vm1, %v164_v36 }
 0x186   :  { %v291_v56 = vpop.permute.xlu0 %290 }
 0x19c   :  { %v192_v37 = vpop.f32.mrf.mxu2 }
 0x19d   :  { %305 = vrot.lane.b32.xlu1 %v192_v37, %s888_s0 }
 0x1a4   :  { %v194_v38 = vpop.f32.mrf.mxu2 }
 0x1a5   :  { %v788_v39 = vpack.c.bf16 %v194_v38, %v192_v37  ;;  %307 = vrot.lane.b32.xlu1 %v194_v38, %s888_s0 }
 0x1a7   :  { %810 = vst [vmem:[#allocation2] sm:$0xff] %v788_v39   ;;  %v779_v39 = vld [vmem:[#allocation3 + $0x70] sm:$0xff] }
 0x1a8   :  { %578 = vmatpush.bf16.msra.mxu0 %v779_v39 }
 0x1ac   :  { %v197_v40 = vpop.f32.mrf.mxu2 }
 0x1ad   :  { %292 = vrot.lane.b32.xlu1 %v150_v34, %s886_s20  ;;  %309 = vrot.lane.b32.xlu2 %v197_v40, %s888_s0 }
 0x1ae   :  { %v765_v44 = vld [vmem:[#allocation2] sm:$0xff] }
 0x1b4   :  { %v199_v41 = vpop.f32.mrf.mxu2 }
 0x1b5   :  { %v793_v42 = vpack.c.bf16 %v199_v41, %v197_v40  ;;  %311 = vrot.lane.b32.xlu2 %v199_v41, %s888_s0  ;;  %v778_v40 = vld [vmem:[#allocation3 + $0x68] sm:$0xff] }
 0x1b6   :  { %579 = vmatpush.bf16.msra.mxu0 %v778_v40 }
 0x1b7   :  { %811 = vst [vmem:[#allocation2 + $0x8] sm:$0xff] %v793_v42  }
 0x1be   :  { %v766_v43 = vld [vmem:[#allocation2 + $0x8] sm:$0xff] }
 0x1bf   :  { %268 = vmatpush.bf16.msra.mxu3 %v766_v43 }
 0x1c3   :  { %269 = vmatpush.bf16.msra.mxu3 %v765_v44  ;;  %v824_v44 = vld [vmem:[%s997_s3 + $0x2] ss:$0 sm:$0xff] }
 0x1c7   :  { %270 = vmatpush.bf16.msra.mxu3 %v764_v45 }
 0x1ca   :  { %689 = vmatmul.msk.bf16.vlgmr.msra.gmra.mxu3 %vm253_vm2, %v949_v46 }
 0x1cb   :  { %542 = vmatpush.bf16.msrb.mxu3 %v777_v50 }
 0x1cf   :  { %543 = vmatpush.bf16.msrb.mxu3 %v776_v52 }
 0x1da   :  { %690 = vmatmul.msk.bf16.gmra.mxu3 %vm253_vm2, %v956_v47 }
 0x1ea   :  { %691 = vmatmul.msk.bf16.gmra.mxu3 %vm253_vm2, %v963_v48 }
 0x207   :  { %v310_v13 = vpop.permute.xlu2 %309 }
 0x20f   :  { %v306_v53 = vpop.permute.xlu1 %305  ;;  %v312_v17 = vpop.permute.xlu2 %311 }
 0x217   :  { %v308_v54 = vpop.permute.xlu1 %307 }
 0x21f   :  { %v293_v59 = vpop.permute.xlu1 %292 }
 0x24d   :  { %v272_v55 = vpop.f32.mrf.mxu3 }
 0x24e   :  { %v296_v57 = vadd.f32 %v291_v56, %v272_v55 }
 0x250   :  { %v299_v61 = vadd.f32 %v823_v58, %v296_v57  ;;  %v512_v57 = vpop.f32.mrf.mxu0 }
 0x252   :  { %v325_v0 = vmax.f32 %v299_v61, 0.0 }
 0x255   :  { %v274_v60 = vpop.f32.mrf.mxu3 }
 0x256   :  { %v297_v62 = vadd.f32 %v293_v59, %v274_v60  ;;  %v822_v59 = vld [vmem:[%s997_s3 + $0x3] ss:$0 sm:$0xff]  ;;  %s889_s3 = smov [#allocation6]  }
 0x257   :  { %v518_v61 = vadd.f32 %v822_v59, %v512_v57  ;;  %s612_s14 = sshll.u32 %s889_s3, 4  ;;  %s613_s14 = int_to_ptr.vmem [resolvable:$true] %s612_s14 }
 0x258   :  { %v300_v63 = vadd.f32 %v823_v58, %v297_v62 }
 0x25a   :  { %v326_v1 = vmax.f32 %v300_v63, 0.0 }
 0x25c   :  { %v331_v2 = vpack.c.bf16 %v326_v1, %v325_v0 }
 0x25d   :  { %v277_v3 = vpop.f32.mrf.mxu3 }
 0x25e   :  { %700 = vmatmul.msk.bf16.vlgmr.msrb.gmra.mxu1 %vm135_vm1, %v331_v2  ;;  %743 = vmatmul.msk.bf16.vlgmr.msrb.gmra.mxu3 %vm135_vm1, %v331_v2  ;;  %v317_v6 = vadd.f32 %v306_v53, %v277_v3 }
 0x260   :  { %v321_v8 = vadd.f32 %v823_v58, %v317_v6 }
 0x262   :  { %v327_v11 = vmax.f32 %v321_v8, 0.0 }
 0x265   :  { %v279_v7 = vpop.f32.mrf.mxu3 }
 0x266   :  { %v318_v9 = vadd.f32 %v308_v54, %v279_v7 }
 0x268   :  { %v322_v10 = vadd.f32 %v823_v58, %v318_v9 }
 0x26a   :  { %v328_v12 = vmax.f32 %v322_v10, 0.0 }
 0x26c   :  { %v365_v14 = vpack.c.bf16 %v328_v12, %v327_v11 }
 0x26d   :  { %v282_v15 = vpop.f32.mrf.mxu3 }
 0x26e   :  { %373 = vrot.lane.b32.xlu2 %v365_v14, %s888_s0  ;;  %v319_v16 = vadd.f32 %v310_v13, %v282_v15 }
 0x270   :  { %v323_v19 = vadd.f32 %v823_v58, %v319_v16 }
 0x272   :  { %v329_v22 = vmax.f32 %v323_v19, 0.0 }
 0x275   :  { %v284_v18 = vpop.f32.mrf.mxu3 }
 0x276   :  { %v320_v20 = vadd.f32 %v312_v17, %v284_v18 }
 0x278   :  { %v324_v21 = vadd.f32 %v823_v58, %v320_v20  ;;  %v514_v58 = vpop.f32.mrf.mxu0 }
 0x279   :  { %v519_v2 = vadd.f32 %v822_v59, %v514_v58 }
 0x27a   :  { %v330_v23 = vmax.f32 %v324_v21, 0.0 }
 0x27c   :  { %v366_v24 = vpack.c.bf16 %v330_v23, %v329_v22 }
 0x27e   :  { %375 = vrot.lane.b32.xlu0 %v366_v24, %s888_s0 }
 0x2c8   :  { %v374_v25 = vpop.permute.xlu2 %373 }
 0x2c9   :  { %709 = vmatmul.msk.bf16.vlgmr.msra.gmra.mxu1 %vm135_vm1, %v374_v25 }
 0x2db   :  { %v360_v26 = vpop.f32.mrf.mxu1 }
 0x2dc   :  { %473 = vrot.lane.b32.xlu1 %v360_v26, %s886_s20 }
 0x2e1   :  { %v545_v60 = vpop.f32.mrf.mxu3 }
 0x2e2   :  { %v550_v62 = vadd.f32 %v545_v60, %v518_v61 }
 0x2e3   :  { %v362_v27 = vpop.f32.mrf.mxu1 }
 0x2e4   :  { %v798_v28 = vpack.c.bf16 %v362_v27, %v360_v26  ;;  %475 = vrot.lane.b32.xlu2 %v362_v27, %s886_s20 }
 0x2e6   :  { %799 = vst [vmem:[#allocation2 + $0x10] sm:$0xff] %v798_v28  }
 0x2e9   :  { %v547_v1 = vpop.f32.mrf.mxu3 }
 0x2ea   :  { %v551_v3 = vadd.f32 %v547_v1, %v519_v2 }
 0x2ed   :  { %v771_v38 = vld [vmem:[#allocation2 + $0x10] sm:$0xff] }
 0x2f0   :  { %v376_v29 = vpop.permute.xlu0 %375 }
 0x2f1   :  { %710 = vmatmul.msk.bf16.gmra.mxu1 %vm135_vm1, %v376_v29 }
 0x33e   :  { %v476_v45 = vpop.permute.xlu2 %475 }
 0x346   :  { %v404_v30 = vpop.f32.mrf.mxu1 }
 0x34e   :  { %v406_v31 = vpop.f32.mrf.mxu1  ;;  %v474_v42 = vpop.permute.xlu1 %473 }
 0x34f   :  { %v803_v32 = vpack.c.bf16 %v406_v31, %v404_v30 }
 0x351   :  { %812 = vst [vmem:[#allocation2] sm:$0xff] %v803_v32  }
 0x358   :  { %v772_v37 = vld [vmem:[#allocation2] sm:$0xff] }
 0x36e   :  { %v409_v33 = vpop.f32.mrf.mxu1 }
 0x376   :  { %v411_v34 = vpop.f32.mrf.mxu1 }
 0x377   :  { %v808_v35 = vpack.c.bf16 %v411_v34, %v409_v33 }
 0x379   :  { %813 = vst [vmem:[#allocation2 + $0x8] sm:$0xff] %v808_v35  }
 0x380   :  { %v773_v36 = vld [vmem:[#allocation2 + $0x8] sm:$0xff] }
 0x381   :  { %455 = vmatpush.bf16.msrb.mxu2 %v773_v36 }
 0x385   :  { %456 = vmatpush.bf16.msrb.mxu2 %v772_v37 }
 0x389   :  { %457 = vmatpush.bf16.msrb.mxu2 %v771_v38 }
 0x38c   :  { %723 = vmatmul.msk.bf16.vlgmr.msrb.gmra.mxu2 %vm253_vm2, %v949_v46 }
 0x39c   :  { %724 = vmatmul.msk.bf16.gmra.mxu2 %vm253_vm2, %v956_v47 }
 0x3ac   :  { %725 = vmatmul.msk.bf16.gmra.mxu2 %vm253_vm2, %v963_v48 }
 0x40f   :  { %v459_v41 = vpop.f32.mrf.mxu2 }
 0x410   :  { %v479_v43 = vadd.f32 %v474_v42, %v459_v41 }
 0x412   :  { %v482_v46 = vadd.f32 %v824_v44, %v479_v43 }
 0x414   :  { %v484_v47 = vmax.f32 %v482_v46, 0.0 }
 0x417   :  { %v461_v49 = vpop.f32.mrf.mxu2 }
 0x418   :  { %v480_v50 = vadd.f32 %v476_v45, %v461_v49 }
 0x41a   :  { %v483_v51 = vadd.f32 %v824_v44, %v480_v50 }
 0x41c   :  { %v485_v52 = vmax.f32 %v483_v51, 0.0 }
 0x41e   :  { %v552_v53 = vpack.c.bf16 %v485_v52, %v484_v47 }
 0x41f   :  { %v464_v48 = vpop.f32.mrf.mxu2 }
 0x420   :  { %752 = vmatmul.msk.bf16.vlgmr.msra.gmra.mxu0 %vm135_vm1, %v552_v53 }
 0x427   :  { %v465_v54 = vpop.f32.mrf.mxu2 }
 0x42f   :  { %v467_v55 = vpop.f32.mrf.mxu2 }
 0x437   :  { %v468_v56 = vpop.f32.mrf.mxu2 }
 0x49d   :  { %v581_v63 = vpop.f32.mrf.mxu0 }
 0x49e   :  { %v586_v0 = vadd.f32 %v581_v63, %v550_v62 }
 0x4a0   :  { %588 = vmax.xlane.f32.xlu0 %v586_v0 }
 0x4a5   :  { %v583_v4 = vpop.f32.mrf.mxu0 }
 0x4a6   :  { %v587_v5 = vadd.f32 %v583_v4, %v551_v3 }
 0x4a8   :  { %590 = vmax.xlane.f32.xlu1 %v587_v5 }
 0x513   :  { %v589_v6 = vpop.xlane.xlu0 %588 }
 0x514   :  { %v592_v7 = vsub.f32 %v586_v0, %v589_v6 }
 0x516   :  { %v594_v8 = vmul.f32 1.442695, %v592_v7 }
 0x518   :  { %825 = vpow2.f32 %v594_v8 }
 0x51b   :  { %v591_v9 = vpop.xlane.xlu1 %590 }
 0x51c   :  { %v593_v10 = vsub.f32 %v587_v5, %v591_v9 }
 0x51e   :  { %v826_v11 = vpop.eup %825  ;;  %v596_v12 = vmul.f32 1.442695, %v593_v10 }
 0x51f   :  { %598 = vadd.xlane.f32.xlu2 %v826_v11 }
 0x520   :  { %827 = vpow2.f32 %v596_v12 }
 0x526   :  { %v828_v13 = vpop.eup %827 }
 0x527   :  { %600 = vadd.xlane.f32.xlu2 %v828_v13 }
 0x592   :  { %v599_v14 = vpop.xlane.xlu2 %598 }
 0x593   :  { %829 = vrcp.f32 %v599_v14 }
 0x599   :  { %v830_v15 = vpop.eup %829 }
 0x59a   :  { %v604_v16 = vmul.f32 %v830_v15, %v826_v11  ;;  %v601_v17 = vpop.xlane.xlu2 %600 }
 0x59b   :  { %831 = vrcp.f32 %v601_v17 }
 0x59c   :  { %606 = vst [vmem:[#allocation6] sm:$0xff] %v604_v16 }
 0x5a1   :  { %v832_v18 = vpop.eup %831 }
 0x5a2   :  { %v605_v19 = vmul.f32 %v832_v18, %v828_v13 }
 0x5a4   :  { %607 = vst [vmem:[#allocation6 + $0x8] sm:$0xff] %v605_v19 }
 0x5a5   :  { %620 = dma.vmem_to_hbm [thread:$0]  %s613_s14, 256, %s615_s17, [#allocation5], %s890_s18, %s890_s18, %s891_s19  }
 0x5a6   :  { %883 = dma.done.wait [#allocation5], 256  }
 0x5a7   :  { %884 = vsyncadd [#allocation5], 4294967040 }
 0x5a8   :  { %625 = vsyncpa [#allocation4], 1 }
 0x5a9   :  { %626 = vsyncpa [#allocation5], 1 }

</bundles_post_ra>
